<compile_context>
chip_gen: v6e
topology: v6e:2x2x1
jax: 0.10.0
libtpu: 0.0.40
codegen_flags: <defaults>
</compile_context>

<pallas_src>
import jax
import jax.numpy as jnp
from jax.experimental import pallas as pl
from jax.experimental.pallas import tpu as pltpu


def _round_up(x: int, m: int) -> int:
    return ((x + m - 1) // m) * m


_MIB = 1 << 20
_VMEM_TILE_BUDGET = 32 * _MIB   # double-buffered tile budget; safe on v7x (64 MiB phys)
_VMEM_LIMIT_CAP = 48 * _MIB


# ---------------------------------------------------------------------------
# Kernels
# ---------------------------------------------------------------------------

def _linear_kernel_fullk(x_ref, w_ref, b_ref, o_ref):
    """Whole reduction in one MXU pass; bias fused into the store."""
    acc = jnp.dot(x_ref[...], w_ref[...], preferred_element_type=jnp.float32)
    o_ref[...] = (acc + b_ref[...]).astype(o_ref.dtype)


def _linear_kernel_ksplit(x_ref, w_ref, b_ref, o_ref, acc_ref):
    """K-split fallback for very large D_in: resident f32 accumulator,
    bias folded into the k==0 init (no epilogue add)."""
    k = pl.program_id(2)

    @pl.when(k == 0)
    def _():
        acc_ref[...] = jnp.broadcast_to(
            b_ref[...].astype(jnp.float32), acc_ref.shape)

    acc_ref[...] += jnp.dot(
        x_ref[...], w_ref[...], preferred_element_type=jnp.float32)

    @pl.when(k == pl.num_programs(2) - 1)
    def _():
        o_ref[...] = acc_ref[...].astype(o_ref.dtype)


# ---------------------------------------------------------------------------
# Forward factory (all sizing decisions are static / made once)
# ---------------------------------------------------------------------------

def _make_forward(*, d_in, d_out, k_pad, n_pad, tm_max, tn, tk, k_steps,
                  m_align, compute_dtype, vmem_limit_bytes):
    single_k = (k_steps == 1)

    @jax.jit
    def forward(x, w, b):
        out_dtype = x.dtype
        leading = x.shape[:-1]
        x2 = x.reshape(-1, d_in)
        rows = x2.shape[0]

        # Clamp the M tile to the (aligned) batch; static at trace time.
        tm = min(tm_max, _round_up(rows, m_align))
        m_pad = _round_up(rows, tm)

        x2 = x2.astype(compute_dtype)
        if (m_pad, k_pad) != (rows, d_in):
            x2 = jnp.pad(x2, ((0, m_pad - rows), (0, k_pad - d_in)))

        if single_k:
            out_padded = pl.pallas_call(
                _linear_kernel_fullk,
                out_shape=jax.ShapeDtypeStruct((m_pad, n_pad), out_dtype),
                grid_spec=pltpu.PrefetchScalarGridSpec(
                    num_scalar_prefetch=0,
                    grid=(m_pad // tm, n_pad // tn),
                    in_specs=[
                        pl.BlockSpec((tm, k_pad), lambda i, j: (i, 0)),   # x
                        pl.BlockSpec((k_pad, tn), lambda i, j: (0, j)),   # W
                        pl.BlockSpec((1, tn), lambda i, j: (0, j)),       # bias
                    ],
                    out_specs=pl.BlockSpec((tm, tn), lambda i, j: (i, j)),
                ),
                compiler_params=pltpu.CompilerParams(
                    dimension_semantics=("parallel", "parallel"),
                    vmem_limit_bytes=vmem_limit_bytes,
                ),
            )(x2, w, b)
        else:
            out_padded = pl.pallas_call(
                _linear_kernel_ksplit,
                out_shape=jax.ShapeDtypeStruct((m_pad, n_pad), out_dtype),
                grid_spec=pltpu.PrefetchScalarGridSpec(
                    num_scalar_prefetch=0,
                    grid=(m_pad // tm, n_pad // tn, k_steps),
                    in_specs=[
                        pl.BlockSpec((tm, tk), lambda i, j, k: (i, k)),
                        pl.BlockSpec((tk, tn), lambda i, j, k: (k, j)),
                        pl.BlockSpec((1, tn), lambda i, j, k: (0, j)),
                    ],
                    out_specs=pl.BlockSpec((tm, tn), lambda i, j, k: (i, j)),
                    scratch_shapes=[pltpu.VMEM((tm, tn), jnp.float32)],
                ),
                compiler_params=pltpu.CompilerParams(
                    dimension_semantics=("parallel", "parallel", "arbitrary"),
                    vmem_limit_bytes=vmem_limit_bytes,
                ),
            )(x2, w, b)

        out = out_padded[:rows, :d_out]
        return out.reshape(*leading, d_out)

    return forward


class PallasTextEncoder:
    """Pallas-TPU equivalent of TextEncoder(input_size, hidden_size).

    Takes PyTorch parameter layout: weight [hidden, input], bias [hidden].
    Weight transpose / padding / dtype cast is done once here, not per call.
    """

    def __init__(self, weight, bias, *, compute_dtype=jnp.bfloat16,
                 tm=512, tn=512, tk=None):
        weight = jnp.asarray(weight)
        bias = jnp.asarray(bias)
        d_out, d_in = weight.shape

        in_bytes = jnp.dtype(compute_dtype).itemsize
        out_bytes = 4                               # worst case (f32 output)
        m_align = 16 if in_bytes < 4 else 8         # bf16 packs 2 rows / sublane

        # --- N tile --------------------------------------------------------
        tn = min(_round_up(tn, 128), _round_up(d_out, 128))
        n_pad = _round_up(d_out, tn)

        # --- M tile upper bound (clamped to the batch at call time) --------
        tm_max = max(m_align, _round_up(tm, m_align))

        # --- K tile: prefer the whole reduction in a single step -----------
        def tile_bytes(tk_, multi):
            f = 2 * (tm_max * tk_ + tk_ * tn) * in_bytes   # double-buffered ins
            f += 2 * tm_max * tn * out_bytes                # double-buffered out
            if multi:
                f += tm_max * tn * 4                        # f32 accumulator
            return f

        k_full = _round_up(d_in, m_align)
        if tk is None and tile_bytes(k_full, multi=False) <= _VMEM_TILE_BUDGET:
            tk, k_pad, k_steps = k_full, k_full, 1
        else:
            if tk is None:
                tk = 512
            tk = min(_round_up(tk, 128), _round_up(d_in, 128))
            while tk > 128 and tile_bytes(tk, multi=True) > _VMEM_TILE_BUDGET:
                tk = _round_up(tk // 2, 128)
            k_pad = _round_up(d_in, tk)
            k_steps = k_pad // tk

        footprint = tile_bytes(tk, multi=(k_steps > 1))
        vmem_limit_bytes = int(
            min(_VMEM_LIMIT_CAP, max(32 * _MIB, footprint + 8 * _MIB)))

        # --- one-time parameter prep (never re-done per forward) -----------
        w = weight.T                                        # [d_in, d_out]
        if (k_pad, n_pad) != (d_in, d_out):
            w = jnp.pad(w, ((0, k_pad - d_in), (0, n_pad - d_out)))
        self.w = w.astype(compute_dtype)

        b2 = bias.reshape(1, d_out).astype(jnp.float32)
        if n_pad != d_out:
            b2 = jnp.pad(b2, ((0, 0), (0, n_pad - d_out)))
        self.b = b2

        self.d_in, self.d_out = d_in, d_out
        self._forward = _make_forward(
            d_in=d_in, d_out=d_out, k_pad=k_pad, n_pad=n_pad,
            tm_max=tm_max, tn=tn, tk=tk, k_steps=k_steps, m_align=m_align,
            compute_dtype=compute_dtype, vmem_limit_bytes=vmem_limit_bytes)

    def __call__(self, x):
        return self._forward(x, self.w, self.b)


if __name__ == "__main__":
    key = jax.random.PRNGKey(0)
    k_x, k_w, k_b = jax.random.split(key, 3)

    # Small shapes consistent with TextEncoder(input_size, hidden_size).
    batch = 8
    input_size = 32
    hidden_size = 16

    x = jax.random.normal(k_x, (batch, input_size), dtype=jnp.float32)
    # PyTorch parameter layout: weight [hidden, input], bias [hidden].
    w_torch = jax.random.normal(k_w, (hidden_size, input_size), dtype=jnp.float32) * 0.1
    b_torch = jax.random.normal(k_b, (hidden_size,), dtype=jnp.float32) * 0.1

    ref = x @ w_torch.T + b_torch

    # Default (bf16 operand) path — f32 accumulation, f32 output.
    enc = PallasTextEncoder(w_torch, b_torch)
    out = jax.block_until_ready(enc(x))
    assert out.shape == (batch, hidden_size)
    assert out.dtype == x.dtype
    assert jnp.allclose(out, ref, atol=3e-2, rtol=3e-2), float(
        jnp.max(jnp.abs(out - ref)))

    # Exact f32 path for strict numerical parity with nn.Linear.
    enc_f32 = PallasTextEncoder(w_torch, b_torch, compute_dtype=jnp.float32)
    out_f32 = jax.block_until_ready(enc_f32(x))
    assert jnp.allclose(out_f32, ref, atol=1e-5, rtol=1e-5)

    # TODO(synk): at these toy sizes the call is launch-overhead dominated;
    # in production this linear would be fused into a larger kernel.
    print("KERNEL_OK")
</pallas_src>

<mosaic_0001>
module attributes {stable_mosaic.version = 11 : i64} {
  func.func @_linear_kernel_fullk(%arg0: i32, %arg1: i32, %arg2: memref<16x32xbf16, #tpu.memory_space<vmem>>, %arg3: memref<32x128xbf16, #tpu.memory_space<vmem>>, %arg4: memref<1x128xf32, #tpu.memory_space<vmem>>, %arg5: memref<16x128xf32, #tpu.memory_space<vmem>>) attributes {dimension_semantics = [#tpu.dimension_semantics<parallel>, #tpu.dimension_semantics<parallel>], iteration_bounds = array<i64: 1, 1>, scalar_prefetch = 0 : i64, scratch_operands = 0 : i64, tpu.core_type = #tpu.core_type<tc>, window_params = [{transform_indices = @transform_0, window_bounds = array<i64: 16, 32>}, {transform_indices = @transform_1, window_bounds = array<i64: 32, 128>}, {transform_indices = @transform_2, window_bounds = array<i64: 1, 128>}, {transform_indices = @transform_3, window_bounds = array<i64: 16, 128>}]} {
    %c0 = arith.constant 0 : index
    %c0_0 = arith.constant 0 : index
    %0 = vector.load %arg2[%c0, %c0_0] : memref<16x32xbf16, #tpu.memory_space<vmem>>, vector<16x32xbf16>
    %c0_1 = arith.constant 0 : index
    %c0_2 = arith.constant 0 : index
    %1 = vector.load %arg3[%c0_1, %c0_2] : memref<32x128xbf16, #tpu.memory_space<vmem>>, vector<32x128xbf16>
    %cst = arith.constant dense<0.000000e+00> : vector<16x128xf32>
    %2 = tpu.matmul %0, %1, %cst {dimension_numbers = #tpu.dot_dimension_numbers<[1], [0], [0], [1], [0, 0, 1, 1], [], []>} : vector<16x32xbf16>, vector<32x128xbf16>, vector<16x128xf32> -> vector<16x128xf32>
    %c0_3 = arith.constant 0 : index
    %c0_4 = arith.constant 0 : index
    %3 = vector.load %arg4[%c0_3, %c0_4] : memref<1x128xf32, #tpu.memory_space<vmem>>, vector<1x128xf32>
    %4 = vector.broadcast %3 : vector<1x128xf32> to vector<16x128xf32>
    %5 = arith.addf %2, %4 : vector<16x128xf32>
    %c0_5 = arith.constant 0 : index
    %c0_6 = arith.constant 0 : index
    %6 = vector.load %arg5[%c0_5, %c0_6] : memref<16x128xf32, #tpu.memory_space<vmem>>, vector<16x128xf32>
    tpu.vector_store %arg5[%c0_5, %c0_6], %5 {strides = array<i32>} : memref<16x128xf32, #tpu.memory_space<vmem>>, vector<16x128xf32>,
    return
  }
  func.func @transform_0(%arg0: i32, %arg1: i32) -> (i32, i32) {
    %c0_i32 = arith.constant 0 : i32
    %c0_i32_0 = arith.constant 0 : i32
    return %arg0, %c0_i32 : i32, i32
  }
  func.func @transform_1(%arg0: i32, %arg1: i32) -> (i32, i32) {
    %c0_i32 = arith.constant 0 : i32
    %c0_i32_0 = arith.constant 0 : i32
    return %c0_i32, %arg1 : i32, i32
  }
  func.func @transform_2(%arg0: i32, %arg1: i32) -> (i32, i32) {
    %c0_i32 = arith.constant 0 : i32
    %c0_i32_0 = arith.constant 0 : i32
    return %c0_i32, %arg1 : i32, i32
  }
  func.func @transform_3(%arg0: i32, %arg1: i32) -> (i32, i32) {
    %c0_i32 = arith.constant 0 : i32
    return %arg0, %arg1 : i32, i32
  }
}

</mosaic_0001>

<bundles_post_ra>
// kernel: forward.1
= control target key start
LH: loop header
LB: loop body
LE: loop exit
PB: predicated region body
PF: predicated region fallthrough
CT: control target
= control target key end

     0   :  { %v117_v0 = vmov 0.0   ;;  %vm118_vm0 = vmmov 0   ;;  %vm45_vm1 = vcmask 261120   ;;  %s157_s1 = inlined_call_operand.vmem [shape: bf16[32,128], index: 1, kind: input, shape index: {}]   ;;  %s158_s0 = inlined_call_operand.vmem [shape: bf16[16,32], index: 0, kind: input, shape index: {}]   ;;  %s159_s2 = inlined_call_operand.vmem [shape: f32[1,128], index: 2, kind: input, shape index: {}]   ;;  %s160_s3 = inlined_call_operand.vmem [shape: f32[16,128], index: 3, kind: output, shape index: {}]  }
   0x1   :  { %104 = vmatprep.subr.bf16.mxu0 %v117_v0  ;;  %v114_v1 = vld [vmem:[%s157_s1 + $0x8] sm:$0xff]   ;;  %108 = vmatprep.mubr.msk.bf16.mxu0 %vm118_vm0, %v117_v0  ;;  %v115_v2 = vld [vmem:[%s157_s1] sm:$0xff]  }
   0x2   :  { %105 = vmatpush3.bf16.msra.mxu0 %v114_v1  ;;  %v116_v3 = vld [vmem:[%s158_s0] sm:$0xff]  }
   0x3   :  { %106 = vmatprep.subr.bf16.mxu0 %v117_v0  ;;  %v96_v4 = vld [vmem:[%s159_s2] ss:$0 sm:$0xff] }
   0x6   :  { %107 = vmatpush3.bf16.msra.mxu0 %v115_v2 }
   0x9   :  { %109 = vmatmul.mubr.msk.bf16.vlgmr.msra.gmra.mxu0 %vm45_vm1, %v116_v3 }
  0xc9   :  { %v83_v5 = vpop.f32.mrf.mxu0 }
  0xca   :  { %v84_v6 = vadd.f32 %v96_v4, %v83_v5 }
  0xcb   :  { %v110_v7 = vpop.f32.mrf.mxu0 }
  0xcc   :  { %90 = vst [vmem:[%s160_s3] sm:$0xff] %v84_v6 }
  0xcd   :  { %v86_v8 = vpop.f32.mrf.mxu0 }
  0xce   :  { %v87_v9 = vadd.f32 %v96_v4, %v86_v8 }
  0xcf   :  { %v111_v10 = vpop.f32.mrf.mxu0 }
  0xd0   :  { %91 = vst [vmem:[%s160_s3 + $0x8] sm:$0xff] %v87_v9 }

</bundles_post_ra>
